<compile_context>
chip_gen: v5e
topology: v5e:2x2
jax: 0.10.0
libtpu: 0.0.40
codegen_flags: <defaults>
</compile_context>

<pallas_src>
import math
import jax
import jax.numpy as jnp
from jax.experimental import pallas as pl
from jax.experimental.pallas import tpu as pltpu

LANES = 128
UNITS = [3, 3, 3, 1]
IN_SIZE = 2  # (x, force) after the concat in MLP.forward

# Offsets into the packed SMEM parameter vector (34 scalars total).
_W1X, _B1, _W2, _B2, _W3, _B3, _W4, _B4 = 0, 3, 6, 15, 18, 27, 30, 33
_NPARAMS = 34


def _softplus(v):
    # Branch-free, numerically safe softplus; exp/log go to the EUP slot.
    # Matches torch.nn.Softplus (beta=1, threshold=20) to within f32 eps.
    return jnp.maximum(v, 0.0) + jnp.log(1.0 + jnp.exp(-jnp.abs(v)))


def _mlp_compute(p_ref, x):
    """Shared body: (rows,128) samples -> (rows,128) scalar MLP outputs z."""
    # layer 1 (concat + force folded into b1_eff):  h_j = sp(x*w1x_j + b1eff_j)
    h = [_softplus(x * p_ref[_W1X + j] + p_ref[_B1 + j]) for j in range(3)]

    # layer 2: g_k = sp(sum_j h_j * W2[j,k] + b2[k])
    g = []
    for k in range(3):
        acc = h[0] * p_ref[_W2 + 0 * 3 + k]
        acc = acc + h[1] * p_ref[_W2 + 1 * 3 + k]
        acc = acc + h[2] * p_ref[_W2 + 2 * 3 + k]
        g.append(_softplus(acc + p_ref[_B2 + k]))

    # layer 3
    t = []
    for k in range(3):
        acc = g[0] * p_ref[_W3 + 0 * 3 + k]
        acc = acc + g[1] * p_ref[_W3 + 1 * 3 + k]
        acc = acc + g[2] * p_ref[_W3 + 2 * 3 + k]
        t.append(_softplus(acc + p_ref[_B3 + k]))

    # layer 4 (linear, scalar output per sample)
    return (t[0] * p_ref[_W4 + 0] + t[1] * p_ref[_W4 + 1]
            + t[2] * p_ref[_W4 + 2] + p_ref[_B4])


def mlp_kernel(p_ref, x_ref, o_ref):
    """MLP.forward: o = MLP(x, force)."""
    o_ref[...] = _mlp_compute(p_ref, x_ref[...])


def disp_kernel(p_ref, x_ref, o_ref):
    """getDisplacement fused: o = x * x * MLP(x, force).

    Padded lanes carry x = 0, so the fused multiply writes exactly 0 there
    (no inf/NaN even though the bias-only MLP value is nonzero).
    """
    x = x_ref[...]
    o_ref[...] = x * x * _mlp_compute(p_ref, x)


def init_params(key):
    """nn.Linear default init U(-1/sqrt(fan_in), 1/sqrt(fan_in)); weights (in,out)."""
    params = []
    fan_in = IN_SIZE
    for u in UNITS:
        key, kw, kb = jax.random.split(key, 3)
        bound = 1.0 / math.sqrt(fan_in)
        w = jax.random.uniform(kw, (fan_in, u), jnp.float32, -bound, bound)
        b = jax.random.uniform(kb, (u,), jnp.float32, -bound, bound)
        params.append((w, b))
        fan_in = u
    return params


def pack_params(params, force):
    """Flatten all weights into one SMEM vector; fold force into layer-1 bias."""
    (w1, b1), (w2, b2), (w3, b3), (w4, b4) = params
    b1_eff = force * w1[1, :] + b1  # concat(x, force) @ W1 == x*W1[0,:] + b1_eff
    vec = jnp.concatenate([
        w1[0, :],          # 3  : _W1X
        b1_eff,            # 3  : _B1
        w2.reshape(-1),    # 9  : _W2   (row-major: W2[j,k] at j*3+k)
        b2,                # 3  : _B2
        w3.reshape(-1),    # 9  : _W3
        b3,                # 3  : _B3
        w4.reshape(-1),    # 3  : _W4
        b4,                # 1  : _B4
    ]).astype(jnp.float32)
    assert vec.shape == (_NPARAMS,)
    return vec


def _run(kernel_fn, x, force, params, tn):
    """Shared wrapper: pack x into lane-dense tiles and run `kernel_fn`."""
    N = x.shape[0]
    pvec = pack_params(params, jnp.float32(force))

    # tile-size selection: multiple of 8, and >=2 grid steps for non-trivial N
    # so the "parallel" grid axis shards across both TensorCores on v7x.
    tn = max(8, (int(tn) // 8) * 8)
    rows = max(1, pl.cdiv(N, LANES))
    if rows > 16:
        block_rows = min(tn, pl.cdiv(pl.cdiv(rows, 2), 8) * 8)
    else:
        block_rows = min(tn, pl.cdiv(rows, 8) * 8)
    grid_rows = pl.cdiv(rows, block_rows)
    rows_padded = grid_rows * block_rows
    total = rows_padded * LANES

    # lane-dense packing without a zeros+scatter pass: reshape directly when
    # possible, otherwise a single pad of the flat vector.
    x_flat = x.reshape(-1).astype(jnp.float32)
    if total != N:
        x_flat = jnp.pad(x_flat, (0, total - N))
    x2d = x_flat.reshape(rows_padded, LANES)

    cost = pl.CostEstimate(flops=85 * total, transcendentals=18 * total,
                           bytes_accessed=8 * total)

    out2d = pl.pallas_call(
        kernel_fn,
        out_shape=jax.ShapeDtypeStruct((rows_padded, LANES), jnp.float32),
        grid_spec=pltpu.PrefetchScalarGridSpec(
            num_scalar_prefetch=1,
            grid=(grid_rows,),
            in_specs=[pl.BlockSpec((block_rows, LANES), lambda i, p: (i, 0))],
            out_specs=pl.BlockSpec((block_rows, LANES), lambda i, p: (i, 0)),
        ),
        compiler_params=pltpu.CompilerParams(
            dimension_semantics=("parallel",),
            vmem_limit_bytes=32 << 20),
        cost_estimate=cost,
    )(pvec, x2d)

    if total == N:
        return out2d.reshape(N, 1)
    return out2d.reshape(-1)[:N].reshape(N, 1)


def mlp_forward(x, force, params, *, tn=1024):
    """Pallas MLP.forward(x, force); x is (N,1), returns z of shape (N,1)."""
    return _run(mlp_kernel, x, force, params, tn)


def get_displacement(x, force, params, *, tn=1024):
    """getDisplacement: u = x * x * MLP(x, force), fully fused in the kernel."""
    return _run(disp_kernel, x, force, params, tn)


def mlp_ref(x, force, params):
    """Pure-JAX reference with identical semantics to the PyTorch module."""
    h = jnp.concatenate([x, jnp.full_like(x, force)], axis=-1)
    for i, (w, b) in enumerate(params):
        h = h @ w + b
        if i < len(params) - 1:
            h = jax.nn.softplus(h)
    return h


if __name__ == "__main__":
    key = jax.random.PRNGKey(0)
    kx, kp = jax.random.split(key)
    params = init_params(kp)
    test_force = 3.0

    # small nodal-coordinate batch (matches the module's usage)
    N = 16
    x = jax.random.uniform(kx, (N, 1), jnp.float32)  # beam coordinates in [0, 1)
    u = jax.block_until_ready(get_displacement(x, test_force, params))
    u_ref = x * x * mlp_ref(x, test_force, params)
    assert u.shape == (N, 1)
    assert jnp.allclose(u, u_ref, atol=1e-5, rtol=1e-5), "mismatch vs reference (N=16)"

    # plain MLP.forward (no displacement fusion) at the same size
    z = jax.block_until_ready(mlp_forward(x, test_force, params))
    assert jnp.allclose(z, mlp_ref(x, test_force, params), atol=1e-5, rtol=1e-5), \
        "mismatch vs reference (forward, N=16)"

    # exercise the multi-block / megacore path and the padded tail
    N2 = 5000
    x2 = jax.random.uniform(kx, (N2, 1), jnp.float32)
    u2 = jax.block_until_ready(get_displacement(x2, test_force, params, tn=16))
    u2_ref = x2 * x2 * mlp_ref(x2, test_force, params)
    assert jnp.allclose(u2, u2_ref, atol=1e-5, rtol=1e-5), "mismatch vs reference (N=5000)"

    print("KERNEL_OK")
</pallas_src>

<mosaic_0001>
module attributes {stable_mosaic.version = 11 : i64} {
  func.func @disp_kernel(%arg0: i32, %arg1: memref<34xf32, #tpu.memory_space<smem>>, %arg2: memref<8x128xf32, #tpu.memory_space<vmem>>, %arg3: memref<8x128xf32, #tpu.memory_space<vmem>>) attributes {dimension_semantics = [#tpu.dimension_semantics<parallel>], iteration_bounds = array<i64: 1>, scalar_prefetch = 1 : i64, scratch_operands = 0 : i64, tpu.core_type = #tpu.core_type<tc>, window_params = [{transform_indices = @transform_0, window_bounds = array<i64: 8, 128>}, {transform_indices = @transform_1, window_bounds = array<i64: 8, 128>}]} {
    %c0 = arith.constant 0 : index
    %c0_0 = arith.constant 0 : index
    %0 = vector.load %arg2[%c0, %c0_0] : memref<8x128xf32, #tpu.memory_space<vmem>>, vector<8x128xf32>
    %1 = arith.mulf %0, %0 : vector<8x128xf32>
    %c0_1 = arith.constant 0 : index
    %2 = memref.load %arg1[%c0_1] : memref<34xf32, #tpu.memory_space<smem>>
    %3 = vector.broadcast %2 : f32 to vector<8x128xf32>
    %4 = arith.mulf %0, %3 : vector<8x128xf32>
    %c3 = arith.constant 3 : index
    %5 = memref.load %arg1[%c3] : memref<34xf32, #tpu.memory_space<smem>>
    %6 = vector.broadcast %5 : f32 to vector<8x128xf32>
    %7 = arith.addf %4, %6 : vector<8x128xf32>
    %cst = arith.constant 0.000000e+00 : f32
    %8 = vector.broadcast %cst : f32 to vector<8x128xf32>
    %9 = arith.maximumf %7, %8 : vector<8x128xf32>
    %10 = math.absf %7 : vector<8x128xf32>
    %cst_2 = arith.constant 0.000000e+00 : f32
    %11 = vector.broadcast %cst_2 : f32 to vector<8x128xf32>
    %12 = arith.subf %11, %10 : vector<8x128xf32>
    %13 = math.exp %12 : vector<8x128xf32>
    %cst_3 = arith.constant 1.000000e+00 : f32
    %14 = vector.broadcast %cst_3 : f32 to vector<8x128xf32>
    %15 = arith.addf %14, %13 : vector<8x128xf32>
    %16 = math.log %15 : vector<8x128xf32>
    %17 = arith.addf %9, %16 : vector<8x128xf32>
    %c1 = arith.constant 1 : index
    %18 = memref.load %arg1[%c1] : memref<34xf32, #tpu.memory_space<smem>>
    %19 = vector.broadcast %18 : f32 to vector<8x128xf32>
    %20 = arith.mulf %0, %19 : vector<8x128xf32>
    %c4 = arith.constant 4 : index
    %21 = memref.load %arg1[%c4] : memref<34xf32, #tpu.memory_space<smem>>
    %22 = vector.broadcast %21 : f32 to vector<8x128xf32>
    %23 = arith.addf %20, %22 : vector<8x128xf32>
    %cst_4 = arith.constant 0.000000e+00 : f32
    %24 = vector.broadcast %cst_4 : f32 to vector<8x128xf32>
    %25 = arith.maximumf %23, %24 : vector<8x128xf32>
    %26 = math.absf %23 : vector<8x128xf32>
    %cst_5 = arith.constant 0.000000e+00 : f32
    %27 = vector.broadcast %cst_5 : f32 to vector<8x128xf32>
    %28 = arith.subf %27, %26 : vector<8x128xf32>
    %29 = math.exp %28 : vector<8x128xf32>
    %cst_6 = arith.constant 1.000000e+00 : f32
    %30 = vector.broadcast %cst_6 : f32 to vector<8x128xf32>
    %31 = arith.addf %30, %29 : vector<8x128xf32>
    %32 = math.log %31 : vector<8x128xf32>
    %33 = arith.addf %25, %32 : vector<8x128xf32>
    %c2 = arith.constant 2 : index
    %34 = memref.load %arg1[%c2] : memref<34xf32, #tpu.memory_space<smem>>
    %35 = vector.broadcast %34 : f32 to vector<8x128xf32>
    %36 = arith.mulf %0, %35 : vector<8x128xf32>
    %c5 = arith.constant 5 : index
    %37 = memref.load %arg1[%c5] : memref<34xf32, #tpu.memory_space<smem>>
    %38 = vector.broadcast %37 : f32 to vector<8x128xf32>
    %39 = arith.addf %36, %38 : vector<8x128xf32>
    %cst_7 = arith.constant 0.000000e+00 : f32
    %40 = vector.broadcast %cst_7 : f32 to vector<8x128xf32>
    %41 = arith.maximumf %39, %40 : vector<8x128xf32>
    %42 = math.absf %39 : vector<8x128xf32>
    %cst_8 = arith.constant 0.000000e+00 : f32
    %43 = vector.broadcast %cst_8 : f32 to vector<8x128xf32>
    %44 = arith.subf %43, %42 : vector<8x128xf32>
    %45 = math.exp %44 : vector<8x128xf32>
    %cst_9 = arith.constant 1.000000e+00 : f32
    %46 = vector.broadcast %cst_9 : f32 to vector<8x128xf32>
    %47 = arith.addf %46, %45 : vector<8x128xf32>
    %48 = math.log %47 : vector<8x128xf32>
    %49 = arith.addf %41, %48 : vector<8x128xf32>
    %c6 = arith.constant 6 : index
    %50 = memref.load %arg1[%c6] : memref<34xf32, #tpu.memory_space<smem>>
    %51 = vector.broadcast %50 : f32 to vector<8x128xf32>
    %52 = arith.mulf %17, %51 : vector<8x128xf32>
    %c9 = arith.constant 9 : index
    %53 = memref.load %arg1[%c9] : memref<34xf32, #tpu.memory_space<smem>>
    %54 = vector.broadcast %53 : f32 to vector<8x128xf32>
    %55 = arith.mulf %33, %54 : vector<8x128xf32>
    %56 = arith.addf %52, %55 : vector<8x128xf32>
    %c12 = arith.constant 12 : index
    %57 = memref.load %arg1[%c12] : memref<34xf32, #tpu.memory_space<smem>>
    %58 = vector.broadcast %57 : f32 to vector<8x128xf32>
    %59 = arith.mulf %49, %58 : vector<8x128xf32>
    %60 = arith.addf %56, %59 : vector<8x128xf32>
    %c15 = arith.constant 15 : index
    %61 = memref.load %arg1[%c15] : memref<34xf32, #tpu.memory_space<smem>>
    %62 = vector.broadcast %61 : f32 to vector<8x128xf32>
    %63 = arith.addf %60, %62 : vector<8x128xf32>
    %cst_10 = arith.constant 0.000000e+00 : f32
    %64 = vector.broadcast %cst_10 : f32 to vector<8x128xf32>
    %65 = arith.maximumf %63, %64 : vector<8x128xf32>
    %66 = math.absf %63 : vector<8x128xf32>
    %cst_11 = arith.constant 0.000000e+00 : f32
    %67 = vector.broadcast %cst_11 : f32 to vector<8x128xf32>
    %68 = arith.subf %67, %66 : vector<8x128xf32>
    %69 = math.exp %68 : vector<8x128xf32>
    %cst_12 = arith.constant 1.000000e+00 : f32
    %70 = vector.broadcast %cst_12 : f32 to vector<8x128xf32>
    %71 = arith.addf %70, %69 : vector<8x128xf32>
    %72 = math.log %71 : vector<8x128xf32>
    %73 = arith.addf %65, %72 : vector<8x128xf32>
    %c7 = arith.constant 7 : index
    %74 = memref.load %arg1[%c7] : memref<34xf32, #tpu.memory_space<smem>>
    %75 = vector.broadcast %74 : f32 to vector<8x128xf32>
    %76 = arith.mulf %17, %75 : vector<8x128xf32>
    %c10 = arith.constant 10 : index
    %77 = memref.load %arg1[%c10] : memref<34xf32, #tpu.memory_space<smem>>
    %78 = vector.broadcast %77 : f32 to vector<8x128xf32>
    %79 = arith.mulf %33, %78 : vector<8x128xf32>
    %80 = arith.addf %76, %79 : vector<8x128xf32>
    %c13 = arith.constant 13 : index
    %81 = memref.load %arg1[%c13] : memref<34xf32, #tpu.memory_space<smem>>
    %82 = vector.broadcast %81 : f32 to vector<8x128xf32>
    %83 = arith.mulf %49, %82 : vector<8x128xf32>
    %84 = arith.addf %80, %83 : vector<8x128xf32>
    %c16 = arith.constant 16 : index
    %85 = memref.load %arg1[%c16] : memref<34xf32, #tpu.memory_space<smem>>
    %86 = vector.broadcast %85 : f32 to vector<8x128xf32>
    %87 = arith.addf %84, %86 : vector<8x128xf32>
    %cst_13 = arith.constant 0.000000e+00 : f32
    %88 = vector.broadcast %cst_13 : f32 to vector<8x128xf32>
    %89 = arith.maximumf %87, %88 : vector<8x128xf32>
    %90 = math.absf %87 : vector<8x128xf32>
    %cst_14 = arith.constant 0.000000e+00 : f32
    %91 = vector.broadcast %cst_14 : f32 to vector<8x128xf32>
    %92 = arith.subf %91, %90 : vector<8x128xf32>
    %93 = math.exp %92 : vector<8x128xf32>
    %cst_15 = arith.constant 1.000000e+00 : f32
    %94 = vector.broadcast %cst_15 : f32 to vector<8x128xf32>
    %95 = arith.addf %94, %93 : vector<8x128xf32>
    %96 = math.log %95 : vector<8x128xf32>
    %97 = arith.addf %89, %96 : vector<8x128xf32>
    %c8 = arith.constant 8 : index
    %98 = memref.load %arg1[%c8] : memref<34xf32, #tpu.memory_space<smem>>
    %99 = vector.broadcast %98 : f32 to vector<8x128xf32>
    %100 = arith.mulf %17, %99 : vector<8x128xf32>
    %c11 = arith.constant 11 : index
    %101 = memref.load %arg1[%c11] : memref<34xf32, #tpu.memory_space<smem>>
    %102 = vector.broadcast %101 : f32 to vector<8x128xf32>
    %103 = arith.mulf %33, %102 : vector<8x128xf32>
    %104 = arith.addf %100, %103 : vector<8x128xf32>
    %c14 = arith.constant 14 : index
    %105 = memref.load %arg1[%c14] : memref<34xf32, #tpu.memory_space<smem>>
    %106 = vector.broadcast %105 : f32 to vector<8x128xf32>
    %107 = arith.mulf %49, %106 : vector<8x128xf32>
    %108 = arith.addf %104, %107 : vector<8x128xf32>
    %c17 = arith.constant 17 : index
    %109 = memref.load %arg1[%c17] : memref<34xf32, #tpu.memory_space<smem>>
    %110 = vector.broadcast %109 : f32 to vector<8x128xf32>
    %111 = arith.addf %108, %110 : vector<8x128xf32>
    %cst_16 = arith.constant 0.000000e+00 : f32
    %112 = vector.broadcast %cst_16 : f32 to vector<8x128xf32>
    %113 = arith.maximumf %111, %112 : vector<8x128xf32>
    %114 = math.absf %111 : vector<8x128xf32>
    %cst_17 = arith.constant 0.000000e+00 : f32
    %115 = vector.broadcast %cst_17 : f32 to vector<8x128xf32>
    %116 = arith.subf %115, %114 : vector<8x128xf32>
    %117 = math.exp %116 : vector<8x128xf32>
    %cst_18 = arith.constant 1.000000e+00 : f32
    %118 = vector.broadcast %cst_18 : f32 to vector<8x128xf32>
    %119 = arith.addf %118, %117 : vector<8x128xf32>
    %120 = math.log %119 : vector<8x128xf32>
    %121 = arith.addf %113, %120 : vector<8x128xf32>
    %c18 = arith.constant 18 : index
    %122 = memref.load %arg1[%c18] : memref<34xf32, #tpu.memory_space<smem>>
    %123 = vector.broadcast %122 : f32 to vector<8x128xf32>
    %124 = arith.mulf %73, %123 : vector<8x128xf32>
    %c21 = arith.constant 21 : index
    %125 = memref.load %arg1[%c21] : memref<34xf32, #tpu.memory_space<smem>>
    %126 = vector.broadcast %125 : f32 to vector<8x128xf32>
    %127 = arith.mulf %97, %126 : vector<8x128xf32>
    %128 = arith.addf %124, %127 : vector<8x128xf32>
    %c24 = arith.constant 24 : index
    %129 = memref.load %arg1[%c24] : memref<34xf32, #tpu.memory_space<smem>>
    %130 = vector.broadcast %129 : f32 to vector<8x128xf32>
    %131 = arith.mulf %121, %130 : vector<8x128xf32>
    %132 = arith.addf %128, %131 : vector<8x128xf32>
    %c27 = arith.constant 27 : index
    %133 = memref.load %arg1[%c27] : memref<34xf32, #tpu.memory_space<smem>>
    %134 = vector.broadcast %133 : f32 to vector<8x128xf32>
    %135 = arith.addf %132, %134 : vector<8x128xf32>
    %cst_19 = arith.constant 0.000000e+00 : f32
    %136 = vector.broadcast %cst_19 : f32 to vector<8x128xf32>
    %137 = arith.maximumf %135, %136 : vector<8x128xf32>
    %138 = math.absf %135 : vector<8x128xf32>
    %cst_20 = arith.constant 0.000000e+00 : f32
    %139 = vector.broadcast %cst_20 : f32 to vector<8x128xf32>
    %140 = arith.subf %139, %138 : vector<8x128xf32>
    %141 = math.exp %140 : vector<8x128xf32>
    %cst_21 = arith.constant 1.000000e+00 : f32
    %142 = vector.broadcast %cst_21 : f32 to vector<8x128xf32>
    %143 = arith.addf %142, %141 : vector<8x128xf32>
    %144 = math.log %143 : vector<8x128xf32>
    %145 = arith.addf %137, %144 : vector<8x128xf32>
    %c19 = arith.constant 19 : index
    %146 = memref.load %arg1[%c19] : memref<34xf32, #tpu.memory_space<smem>>
    %147 = vector.broadcast %146 : f32 to vector<8x128xf32>
    %148 = arith.mulf %73, %147 : vector<8x128xf32>
    %c22 = arith.constant 22 : index
    %149 = memref.load %arg1[%c22] : memref<34xf32, #tpu.memory_space<smem>>
    %150 = vector.broadcast %149 : f32 to vector<8x128xf32>
    %151 = arith.mulf %97, %150 : vector<8x128xf32>
    %152 = arith.addf %148, %151 : vector<8x128xf32>
    %c25 = arith.constant 25 : index
    %153 = memref.load %arg1[%c25] : memref<34xf32, #tpu.memory_space<smem>>
    %154 = vector.broadcast %153 : f32 to vector<8x128xf32>
    %155 = arith.mulf %121, %154 : vector<8x128xf32>
    %156 = arith.addf %152, %155 : vector<8x128xf32>
    %c28 = arith.constant 28 : index
    %157 = memref.load %arg1[%c28] : memref<34xf32, #tpu.memory_space<smem>>
    %158 = vector.broadcast %157 : f32 to vector<8x128xf32>
    %159 = arith.addf %156, %158 : vector<8x128xf32>
    %cst_22 = arith.constant 0.000000e+00 : f32
    %160 = vector.broadcast %cst_22 : f32 to vector<8x128xf32>
    %161 = arith.maximumf %159, %160 : vector<8x128xf32>
    %162 = math.absf %159 : vector<8x128xf32>
    %cst_23 = arith.constant 0.000000e+00 : f32
    %163 = vector.broadcast %cst_23 : f32 to vector<8x128xf32>
    %164 = arith.subf %163, %162 : vector<8x128xf32>
    %165 = math.exp %164 : vector<8x128xf32>
    %cst_24 = arith.constant 1.000000e+00 : f32
    %166 = vector.broadcast %cst_24 : f32 to vector<8x128xf32>
    %167 = arith.addf %166, %165 : vector<8x128xf32>
    %168 = math.log %167 : vector<8x128xf32>
    %169 = arith.addf %161, %168 : vector<8x128xf32>
    %c20 = arith.constant 20 : index
    %170 = memref.load %arg1[%c20] : memref<34xf32, #tpu.memory_space<smem>>
    %171 = vector.broadcast %170 : f32 to vector<8x128xf32>
    %172 = arith.mulf %73, %171 : vector<8x128xf32>
    %c23 = arith.constant 23 : index
    %173 = memref.load %arg1[%c23] : memref<34xf32, #tpu.memory_space<smem>>
    %174 = vector.broadcast %173 : f32 to vector<8x128xf32>
    %175 = arith.mulf %97, %174 : vector<8x128xf32>
    %176 = arith.addf %172, %175 : vector<8x128xf32>
    %c26 = arith.constant 26 : index
    %177 = memref.load %arg1[%c26] : memref<34xf32, #tpu.memory_space<smem>>
    %178 = vector.broadcast %177 : f32 to vector<8x128xf32>
    %179 = arith.mulf %121, %178 : vector<8x128xf32>
    %180 = arith.addf %176, %179 : vector<8x128xf32>
    %c29 = arith.constant 29 : index
    %181 = memref.load %arg1[%c29] : memref<34xf32, #tpu.memory_space<smem>>
    %182 = vector.broadcast %181 : f32 to vector<8x128xf32>
    %183 = arith.addf %180, %182 : vector<8x128xf32>
    %cst_25 = arith.constant 0.000000e+00 : f32
    %184 = vector.broadcast %cst_25 : f32 to vector<8x128xf32>
    %185 = arith.maximumf %183, %184 : vector<8x128xf32>
    %186 = math.absf %183 : vector<8x128xf32>
    %cst_26 = arith.constant 0.000000e+00 : f32
    %187 = vector.broadcast %cst_26 : f32 to vector<8x128xf32>
    %188 = arith.subf %187, %186 : vector<8x128xf32>
    %189 = math.exp %188 : vector<8x128xf32>
    %cst_27 = arith.constant 1.000000e+00 : f32
    %190 = vector.broadcast %cst_27 : f32 to vector<8x128xf32>
    %191 = arith.addf %190, %189 : vector<8x128xf32>
    %192 = math.log %191 : vector<8x128xf32>
    %193 = arith.addf %185, %192 : vector<8x128xf32>
    %c30 = arith.constant 30 : index
    %194 = memref.load %arg1[%c30] : memref<34xf32, #tpu.memory_space<smem>>
    %195 = vector.broadcast %194 : f32 to vector<8x128xf32>
    %196 = arith.mulf %145, %195 : vector<8x128xf32>
    %c31 = arith.constant 31 : index
    %197 = memref.load %arg1[%c31] : memref<34xf32, #tpu.memory_space<smem>>
    %198 = vector.broadcast %197 : f32 to vector<8x128xf32>
    %199 = arith.mulf %169, %198 : vector<8x128xf32>
    %200 = arith.addf %196, %199 : vector<8x128xf32>
    %c32 = arith.constant 32 : index
    %201 = memref.load %arg1[%c32] : memref<34xf32, #tpu.memory_space<smem>>
    %202 = vector.broadcast %201 : f32 to vector<8x128xf32>
    %203 = arith.mulf %193, %202 : vector<8x128xf32>
    %204 = arith.addf %200, %203 : vector<8x128xf32>
    %c33 = arith.constant 33 : index
    %205 = memref.load %arg1[%c33] : memref<34xf32, #tpu.memory_space<smem>>
    %206 = vector.broadcast %205 : f32 to vector<8x128xf32>
    %207 = arith.addf %204, %206 : vector<8x128xf32>
    %208 = arith.mulf %1, %207 : vector<8x128xf32>
    %c0_28 = arith.constant 0 : index
    %c0_29 = arith.constant 0 : index
    %209 = vector.load %arg3[%c0_28, %c0_29] : memref<8x128xf32, #tpu.memory_space<vmem>>, vector<8x128xf32>
    tpu.vector_store %arg3[%c0_28, %c0_29], %208 {strides = array<i32>} : memref<8x128xf32, #tpu.memory_space<vmem>>, vector<8x128xf32>,
    return
  }
  func.func @transform_0(%arg0: i32, %arg1: memref<34xf32, #tpu.memory_space<smem>>) -> (i32, i32) {
    %c0_i32 = arith.constant 0 : i32
    %c0_i32_0 = arith.constant 0 : i32
    return %arg0, %c0_i32 : i32, i32
  }
  func.func @transform_1(%arg0: i32, %arg1: memref<34xf32, #tpu.memory_space<smem>>) -> (i32, i32) {
    %c0_i32 = arith.constant 0 : i32
    %c0_i32_0 = arith.constant 0 : i32
    return %arg0, %c0_i32 : i32, i32
  }
}

</mosaic_0001>

<bundles_post_ra>
// kernel: tpu_custom_call.1
= control target key start
LH: loop header
LB: loop body
LE: loop exit
PB: predicated region body
PF: predicated region fallthrough
CT: control target
= control target key end

     0   :  { %s388_s12 = smov [#allocation3]   ;;  %s494_s0 = inlined_call_operand.hbm [shape: f32[34], index: 0, kind: input, shape index: {}]   ;;  %s495_s1 = inlined_call_operand.hbm [shape: f32[8,128], index: 1, kind: input, shape index: {}]   ;;  %s496_s2 = inlined_call_operand.hbm [shape: f32[8,128], index: 2, kind: output, shape index: {}]  }
   0x1   :  { %s8_s11 = sshll.u32 %s494_s0, 4  ;;  %s9_s11 = int_to_ptr.hbm [resolvable:$true] %s8_s11 }
   0x2   :  { %11 = dma.hbm_to_smem %s9_s11, 16, %s388_s12, [#allocation2] }
   0x3   :  { %382 = dma.done.wait [#allocation2], 16 }
   0x4   :  { %383 = vsyncadd [#allocation2], 4294967280 }
   0x5   :  { %14 = sfence }
   0x6   :  { %15 = vsyncpa [#allocation5], 0 }
   0x7   :  { %16 = vsyncpa [#allocation6], 0  ;;  %s22_s15 = sshll.u32 %s495_s1, 4  ;;  %s389_s16 = smov [#allocation4]   ;;  %s23_s15 = int_to_ptr.hbm [resolvable:$true] %s22_s15 }
   0x8   :  { %s24_s17 = sshll.u32 %s389_s16, 4  ;;  %s25_s17 = int_to_ptr.vmem [resolvable:$true] %s24_s17 }
   0x9   :  { %27 = dma.hbm_to_vmem [thread:$0]  %s23_s15, 128, %s25_s17, [#allocation5]  }
   0xa   :  { %384 = dma.done.wait [#allocation5], 128  }
   0xb   :  { %385 = vsyncadd [#allocation5], 4294967168  ;;  %s34_s0 = sld [smem:[#allocation3]]  ;;  %v412_v0 = vld [vmem:[#allocation4] sm:$0xff] }
   0xc   :  { %s250_s18 = sld [smem:[#allocation3 + $0x3]] }
   0xd   :  { %s251_s19 = sld [smem:[#allocation3 + $0x1]] }
   0xe   :  { %s252_s20 = sld [smem:[#allocation3 + $0x4]] }
   0xf   :  { %s253_s21 = sld [smem:[#allocation3 + $0x2]] }
  0x10   :  { %s254_s22 = sld [smem:[#allocation3 + $0x5]] }
  0x11   :  { %v35_v1 = vstv %s34_s0  ;;  %s417_s1 = sld [smem:[#allocation3 + $0x6]] }
  0x12   :  { %v36_v2 = vmul.f32 %v35_v1, %v412_v0  ;;  %v38_v3 = vstv %s250_s18  ;;  %s419_s23 = sld [smem:[#allocation3 + $0x9]] }
  0x13   :  { %v50_v4 = vstv %s251_s19  ;;  %s421_s24 = sld [smem:[#allocation3 + $0xc]] }
  0x14   :  { %v39_v5 = vadd.f32 %v38_v3, %v36_v2  ;;  %v51_v6 = vmul.f32 %v50_v4, %v412_v0  ;;  %v53_v7 = vstv %s252_s20  ;;  %s423_s25 = sld [smem:[#allocation3 + $0x7]] }
  0x15   :  { %v65_v8 = vstv %s253_s21  ;;  %s425_s26 = sld [smem:[#allocation3 + $0xa]]  ;;  %s390_s21 = smov [#allocation7]  }
  0x16   :  { %v41_v9 = vand.u32 2147483647, %v39_v5  ;;  %v54_v10 = vadd.f32 %v53_v7, %v51_v6  ;;  %v66_v11 = vmul.f32 %v65_v8, %v412_v0  ;;  %v68_v12 = vstv %s254_s22  ;;  %s427_s27 = sld [smem:[#allocation3 + $0x8]]  ;;  %s238_s22 = sshll.u32 %s390_s21, 4  ;;  %s239_s22 = int_to_ptr.vmem [resolvable:$true] %s238_s22 }
  0x17   :  { %s429_s28 = sld [smem:[#allocation3 + $0xb]]  ;;  %v40_v28 = vmax.f32 %v39_v5, 0.0  ;;  %v80_v33 = vstv %s417_s1 }
  0x18   :  { %v42_v13 = vsub.f32 0.0, %v41_v9  ;;  %v56_v14 = vand.u32 2147483647, %v54_v10  ;;  %v69_v15 = vadd.f32 %v68_v12, %v66_v11  ;;  %s431_s29 = sld [smem:[#allocation3 + $0xd]]  ;;  %v55_v31 = vmax.f32 %v54_v10, 0.0 }
  0x19   :  { %s433_s30 = sld [smem:[#allocation3 + $0xe]]  ;;  %v83_v40 = vstv %s419_s23  ;;  %v87_v47 = vstv %s421_s24  ;;  %s240_s24 = sshll.u32 %s496_s2, 4  ;;  %s241_s24 = int_to_ptr.hbm [resolvable:$true] %s240_s24 }
  0x1a   :  { %v43_v16 = vmul.f32 1.442695, %v42_v13  ;;  %v57_v17 = vsub.f32 0.0, %v56_v14  ;;  %v71_v18 = vand.u32 2147483647, %v69_v15  ;;  %s435_s3 = sld [smem:[#allocation3 + $0xf]]  ;;  %v103_v34 = vstv %s423_s25 }
  0x1b   :  { %s439_s4 = sld [smem:[#allocation3 + $0x10]]  ;;  %v70_v37 = vmax.f32 %v69_v15, 0.0  ;;  %v106_v41 = vstv %s425_s26 }
  0x1c   :  { %286 = vpow2.f32 %v43_v16  ;;  %v58_v19 = vmul.f32 1.442695, %v57_v17  ;;  %v72_v20 = vsub.f32 0.0, %v71_v18  ;;  %v126_v38 = vstv %s427_s27  ;;  %s442_s5 = sld [smem:[#allocation3 + $0x11]] }
  0x1d   :  { %v129_v42 = vstv %s429_s28  ;;  %s453_s6 = sld [smem:[#allocation3 + $0x12]] }
  0x1e   :  { %288 = vpow2.f32 %v58_v19  ;;  %v73_v21 = vmul.f32 1.442695, %v72_v20  ;;  %v110_v48 = vstv %s431_s29  ;;  %s455_s7 = sld [smem:[#allocation3 + $0x15]] }
  0x1f   :  { %v133_v50 = vstv %s433_s30  ;;  %s457_s8 = sld [smem:[#allocation3 + $0x18]] }
  0x20   :  { %290 = vpow2.f32 %v73_v21  ;;  %v91_v59 = vstv %s435_s3  ;;  %s459_s9 = sld [smem:[#allocation3 + $0x13]] }
  0x21   :  { %v114_v60 = vstv %s439_s4  ;;  %s461_s10 = sld [smem:[#allocation3 + $0x16]] }
  0x22   :  { %v287_v22 = vpop.eup %286  ;;  %v137_v2 = vstv %s442_s5  ;;  %s463_s11 = sld [smem:[#allocation3 + $0x19]] }
  0x23   :  { %v45_v23 = vadd.f32 1.0, %v287_v22  ;;  %s465_s12 = sld [smem:[#allocation3 + $0x14]] }
  0x24   :  { %v289_v24 = vpop.eup %288  ;;  %s467_s13 = sld [smem:[#allocation3 + $0x17]] }
  0x25   :  { %292 = vlog2.f32 %v45_v23  ;;  %v60_v25 = vadd.f32 1.0, %v289_v24  ;;  %s469_s14 = sld [smem:[#allocation3 + $0x1a]] }
  0x26   :  { %v291_v26 = vpop.eup %290  ;;  %s471_s15 = sld [smem:[#allocation3 + $0x1b]] }
  0x27   :  { %294 = vlog2.f32 %v60_v25  ;;  %v75_v27 = vadd.f32 1.0, %v291_v26  ;;  %s473_s16 = sld [smem:[#allocation3 + $0x1c]] }
  0x28   :  { %s476_s17 = sld [smem:[#allocation3 + $0x1d]] }
  0x29   :  { %296 = vlog2.f32 %v75_v27  ;;  %s279_s0 = sld [smem:[#allocation3 + $0x1e]] }
  0x2a   :  { %s280_s18 = sld [smem:[#allocation3 + $0x1f]] }
  0x2b   :  { %v293_v29 = vpop.eup %292  ;;  %s281_s19 = sld [smem:[#allocation3 + $0x20]] }
  0x2c   :  { %v47_v30 = vmul.f32 0.6931472, %v293_v29  ;;  %s282_s20 = sld [smem:[#allocation3 + $0x21]] }
  0x2d   :  { %v295_v32 = vpop.eup %294 }
  0x2e   :  { %v48_v35 = vadd.f32 %v47_v30, %v40_v28  ;;  %v62_v36 = vmul.f32 0.6931472, %v295_v32  ;;  %v149_v28 = vstv %s453_s6  ;;  %v172_v32 = vstv %s459_s9 }
  0x2f   :  { %v297_v39 = vpop.eup %296 }
  0x30   :  { %v63_v43 = vadd.f32 %v62_v36, %v55_v31  ;;  %v77_v44 = vmul.f32 0.6931472, %v297_v39  ;;  %v81_v45 = vmul.f32 %v80_v33, %v48_v35  ;;  %v104_v46 = vmul.f32 %v103_v34, %v48_v35 }
  0x31   :  { %v127_v49 = vmul.f32 %v126_v38, %v48_v35  ;;  %v152_v31 = vstv %s455_s7  ;;  %v195_v33 = vstv %s465_s12  ;;  %v175_v36 = vstv %s461_s10 }
  0x32   :  { %v78_v51 = vadd.f32 %v77_v44, %v70_v37  ;;  %v84_v52 = vmul.f32 %v83_v40, %v63_v43  ;;  %v107_v53 = vmul.f32 %v106_v41, %v63_v43  ;;  %v130_v54 = vmul.f32 %v129_v42, %v63_v43 }
  0x33   :  { %v198_v37 = vstv %s467_s13  ;;  %v156_v39 = vstv %s457_s8  ;;  %v179_v40 = vstv %s463_s11  ;;  %v202_v41 = vstv %s469_s14 }
  0x34   :  { %v85_v55 = vadd.f32 %v84_v52, %v81_v45  ;;  %v88_v56 = vmul.f32 %v87_v47, %v78_v51  ;;  %v108_v57 = vadd.f32 %v107_v53, %v104_v46  ;;  %v111_v58 = vmul.f32 %v110_v48, %v78_v51 }
  0x35   :  { %v131_v61 = vadd.f32 %v130_v54, %v127_v49  ;;  %v134_v62 = vmul.f32 %v133_v50, %v78_v51 }
  0x36   :  { %v89_v63 = vadd.f32 %v88_v56, %v85_v55  ;;  %v112_v1 = vadd.f32 %v111_v58, %v108_v57  ;;  %v160_v55 = vstv %s471_s15  ;;  %v183_v56 = vstv %s473_s16 }
  0x37   :  { %v135_v3 = vadd.f32 %v134_v62, %v131_v61  ;;  %v206_v57 = vstv %s476_s17 }
  0x38   :  { %v92_v4 = vadd.f32 %v91_v59, %v89_v63  ;;  %v115_v5 = vadd.f32 %v114_v60, %v112_v1 }
  0x39   :  { %v138_v6 = vadd.f32 %v137_v2, %v135_v3 }
  0x3a   :  { %v94_v7 = vand.u32 2147483647, %v92_v4  ;;  %v117_v8 = vand.u32 2147483647, %v115_v5  ;;  %v93_v22 = vmax.f32 %v92_v4, 0.0  ;;  %v116_v24 = vmax.f32 %v115_v5, 0.0 }
  0x3b   :  { %v140_v9 = vand.u32 2147483647, %v138_v6  ;;  %v139_v27 = vmax.f32 %v138_v6, 0.0 }
  0x3c   :  { %v95_v10 = vsub.f32 0.0, %v94_v7  ;;  %v118_v11 = vsub.f32 0.0, %v117_v8 }
  0x3d   :  { %v141_v12 = vsub.f32 0.0, %v140_v9 }
  0x3e   :  { %v96_v13 = vmul.f32 1.442695, %v95_v10  ;;  %v119_v14 = vmul.f32 1.442695, %v118_v11 }
  0x3f   :  { %v142_v15 = vmul.f32 1.442695, %v141_v12 }
  0x40   :  { %298 = vpow2.f32 %v96_v13 }
  0x41   :  { %300 = vpow2.f32 %v119_v14 }
  0x42   :  { %302 = vpow2.f32 %v142_v15 }
  0x46   :  { %v299_v16 = vpop.eup %298 }
  0x47   :  { %v301_v17 = vpop.eup %300  ;;  %v98_v18 = vadd.f32 1.0, %v299_v16 }
  0x48   :  { %v303_v19 = vpop.eup %302  ;;  %v121_v20 = vadd.f32 1.0, %v301_v17 }
  0x49   :  { %304 = vlog2.f32 %v98_v18  ;;  %v144_v21 = vadd.f32 1.0, %v303_v19 }
  0x4a   :  { %306 = vlog2.f32 %v121_v20 }
  0x4b   :  { %308 = vlog2.f32 %v144_v21 }
  0x4f   :  { %v305_v23 = vpop.eup %304 }
  0x50   :  { %v307_v25 = vpop.eup %306  ;;  %v100_v26 = vmul.f32 0.6931472, %v305_v23 }
  0x51   :  { %v309_v29 = vpop.eup %308  ;;  %v123_v30 = vmul.f32 0.6931472, %v307_v25 }
  0x52   :  { %v101_v34 = vadd.f32 %v100_v26, %v93_v22  ;;  %v146_v35 = vmul.f32 0.6931472, %v309_v29  ;;  %v225_v29 = vstv %s281_s19 }
  0x53   :  { %v124_v38 = vadd.f32 %v123_v30, %v116_v24  ;;  %v218_v24 = vstv %s279_s0 }
  0x54   :  { %v147_v42 = vadd.f32 %v146_v35, %v139_v27  ;;  %v150_v43 = vmul.f32 %v149_v28, %v101_v34  ;;  %v173_v44 = vmul.f32 %v172_v32, %v101_v34  ;;  %v196_v45 = vmul.f32 %v195_v33, %v101_v34 }
  0x55   :  { %v153_v46 = vmul.f32 %v152_v31, %v124_v38  ;;  %v176_v47 = vmul.f32 %v175_v36, %v124_v38  ;;  %v199_v48 = vmul.f32 %v198_v37, %v124_v38  ;;  %v221_v27 = vstv %s280_s18 }
  0x56   :  { %v157_v49 = vmul.f32 %v156_v39, %v147_v42  ;;  %v180_v50 = vmul.f32 %v179_v40, %v147_v42  ;;  %v203_v51 = vmul.f32 %v202_v41, %v147_v42  ;;  %v229_v35 = vstv %s282_s20 }
  0x57   :  { %v154_v52 = vadd.f32 %v153_v46, %v150_v43  ;;  %v177_v53 = vadd.f32 %v176_v47, %v173_v44  ;;  %v200_v54 = vadd.f32 %v199_v48, %v196_v45  ;;  %v33_v36 = vmul.f32 %v412_v0, %v412_v0 }
  0x59   :  { %v158_v58 = vadd.f32 %v157_v49, %v154_v52  ;;  %v181_v59 = vadd.f32 %v180_v50, %v177_v53  ;;  %v204_v60 = vadd.f32 %v203_v51, %v200_v54 }
  0x5b   :  { %v161_v61 = vadd.f32 %v160_v55, %v158_v58  ;;  %v184_v62 = vadd.f32 %v183_v56, %v181_v59  ;;  %v207_v63 = vadd.f32 %v206_v57, %v204_v60 }
  0x5d   :  { %v163_v1 = vand.u32 2147483647, %v161_v61  ;;  %v186_v2 = vand.u32 2147483647, %v184_v62  ;;  %v209_v3 = vand.u32 2147483647, %v207_v63 }
  0x5e   :  { %v162_v16 = vmax.f32 %v161_v61, 0.0  ;;  %v185_v18 = vmax.f32 %v184_v62, 0.0  ;;  %v208_v21 = vmax.f32 %v207_v63, 0.0 }
  0x5f   :  { %v164_v4 = vsub.f32 0.0, %v163_v1  ;;  %v187_v5 = vsub.f32 0.0, %v186_v2  ;;  %v210_v6 = vsub.f32 0.0, %v209_v3 }
  0x61   :  { %v165_v7 = vmul.f32 1.442695, %v164_v4  ;;  %v188_v8 = vmul.f32 1.442695, %v187_v5  ;;  %v211_v9 = vmul.f32 1.442695, %v210_v6 }
  0x63   :  { %310 = vpow2.f32 %v165_v7 }
  0x64   :  { %312 = vpow2.f32 %v188_v8 }
  0x65   :  { %314 = vpow2.f32 %v211_v9 }
  0x69   :  { %v311_v10 = vpop.eup %310 }
  0x6a   :  { %v313_v11 = vpop.eup %312  ;;  %v167_v12 = vadd.f32 1.0, %v311_v10 }
  0x6b   :  { %v315_v13 = vpop.eup %314  ;;  %v190_v14 = vadd.f32 1.0, %v313_v11 }
  0x6c   :  { %316 = vlog2.f32 %v167_v12  ;;  %v213_v15 = vadd.f32 1.0, %v315_v13 }
  0x6d   :  { %318 = vlog2.f32 %v190_v14 }
  0x6e   :  { %320 = vlog2.f32 %v213_v15 }
  0x72   :  { %v317_v17 = vpop.eup %316 }
  0x73   :  { %v319_v19 = vpop.eup %318  ;;  %v169_v20 = vmul.f32 0.6931472, %v317_v17 }
  0x74   :  { %v321_v22 = vpop.eup %320  ;;  %v192_v23 = vmul.f32 0.6931472, %v319_v19 }
  0x75   :  { %v170_v25 = vadd.f32 %v169_v20, %v162_v16  ;;  %v215_v26 = vmul.f32 0.6931472, %v321_v22 }
  0x76   :  { %v193_v28 = vadd.f32 %v192_v23, %v185_v18 }
  0x77   :  { %v216_v30 = vadd.f32 %v215_v26, %v208_v21  ;;  %v219_v31 = vmul.f32 %v218_v24, %v170_v25 }
  0x78   :  { %v222_v32 = vmul.f32 %v221_v27, %v193_v28 }
  0x79   :  { %v226_v33 = vmul.f32 %v225_v29, %v216_v30 }
  0x7a   :  { %v223_v34 = vadd.f32 %v222_v32, %v219_v31 }
  0x7c   :  { %v227_v37 = vadd.f32 %v226_v33, %v223_v34 }
  0x7e   :  { %v230_v38 = vadd.f32 %v229_v35, %v227_v37 }
  0x80   :  { %v231_v39 = vmul.f32 %v230_v38, %v33_v36 }
  0x82   :  { %232 = vst [vmem:[#allocation7] sm:$0xff] %v231_v39 }
  0x83   :  { %243 = dma.vmem_to_hbm [thread:$0]  %s239_s22, 128, %s241_s24, [#allocation6]  }
  0x84   :  { %386 = dma.done.wait [#allocation6], 128  }
  0x85   :  { %387 = vsyncadd [#allocation6], 4294967168 }
  0x86   :  { %248 = vsyncpa [#allocation5], 1 }
  0x87   :  { %249 = vsyncpa [#allocation6], 1 }

</bundles_post_ra>
